<compile_context>
chip_gen: v6e
topology: v6e:2x2x1
jax: 0.10.0
libtpu: 0.0.40
codegen_flags: <defaults>
</compile_context>

<pallas_src>
import functools

import jax
import jax.numpy as jnp
from jax.experimental import pallas as pl
from jax.experimental.pallas import tpu as pltpu


# ---------------------------------------------------------------------------
# Kernels
# ---------------------------------------------------------------------------
def _norm_rowwise_kernel(x_ref, alpha_ref, bias_ref, o_ref, *, eps, d_model):
    """Per-row norm when the lane axis == d_model.

    Single-pass moments: sum(x) and sum(x*x) are independent, so the two
    cross-lane (XLU) reductions issue back-to-back instead of forming a
    reduce -> broadcast -> reduce chain (matters on v6e/v7x with only 2 XLUs).
    """
    x = x_ref[...].astype(jnp.float32)                        # (T, d)
    inv_n = jnp.float32(1.0 / d_model)
    inv_nm1 = jnp.float32(1.0 / (d_model - 1))
    sum_x = jnp.sum(x, axis=-1, keepdims=True)
    sum_x2 = jnp.sum(x * x, axis=-1, keepdims=True)
    mean = sum_x * inv_n
    # torch.std default is the unbiased estimator (divide by N-1); eps on std.
    var = jnp.maximum((sum_x2 - sum_x * mean) * inv_nm1, 0.0)
    inv = pl.reciprocal(jnp.sqrt(var) + jnp.float32(eps), approx=False)
    o_ref[...] = (alpha_ref[...] * (x - mean) * inv + bias_ref[...]).astype(o_ref.dtype)


def _norm_folded_kernel(x_ref, alpha_ref, bias_ref, seg_ref, segT_ref, o_ref,
                        *, eps, d_model):
    """Lane-dense path: `fold` logical rows packed per 128-lane physical row.

    Segmented (per d_model group) reductions / broadcasts use tiny one-hot
    matmuls on the otherwise-idle MXU so stores stay full-width (unmasked vst).
    The four matmuls form a 2-deep chain: the two moment reductions are
    independent, then the two broadcasts are independent.
    """
    # TODO(synk): if Mosaic mixed-precision dot (f32 x bf16) lowering is
    # available, casting seg/segT to bf16 (exact one-hots) would halve MXU
    # passes on v7x; kept f32 here for guaranteed accuracy of the reductions.
    x = x_ref[...].astype(jnp.float32)                        # (T, L), L = fold*d
    seg = seg_ref[...]                                        # (L, F) one-hot
    segT = segT_ref[...]                                      # (F, L)
    inv_n = jnp.float32(1.0 / d_model)
    inv_nm1 = jnp.float32(1.0 / (d_model - 1))
    # Two *independent* segmented reductions (first / second moment).
    seg_sum = jnp.dot(x, seg, preferred_element_type=jnp.float32)        # (T, F)
    seg_ss = jnp.dot(x * x, seg, preferred_element_type=jnp.float32)     # (T, F)
    mean = seg_sum * inv_n
    var = jnp.maximum((seg_ss - seg_sum * mean) * inv_nm1, 0.0)
    inv = pl.reciprocal(jnp.sqrt(var) + jnp.float32(eps), approx=False)  # (T, F)
    # Two *independent* broadcasts back to the lane layout.
    inv_b = jnp.dot(inv, segT, preferred_element_type=jnp.float32)       # (T, L)
    minv_b = jnp.dot(mean * inv, segT, preferred_element_type=jnp.float32)
    o_ref[...] = (alpha_ref[...] * (x * inv_b - minv_b) + bias_ref[...]).astype(o_ref.dtype)


# ---------------------------------------------------------------------------
# Wrapper
# ---------------------------------------------------------------------------
def _tpu_config():
    """Generation-aware tiling knobs (VMEM capacity is the discriminator)."""
    vmem_cap = 64 << 20                      # conservative default (v7x-class)
    try:
        info = pltpu.get_tpu_info()
        vmem_cap = int(getattr(info, "vmem_capacity_bytes", vmem_cap))
    except Exception:
        pass
    if vmem_cap <= (64 << 20):
        # v7x-class: 64 MiB VMEM/TC, 2 TCs share HBM -> modest blocks, and at
        # least 8 grid steps so both cores get >= 4 pipelined blocks each.
        return dict(target_block_bytes=3 << 20, vmem_limit_bytes=44 << 20,
                    min_steps=8)
    # v5e / v6e: 128 MiB VMEM, 1 TC -> big blocks amortize per-step overhead;
    # still keep >= 4 steps so DMA-in / compute / DMA-out overlap.
    return dict(target_block_bytes=8 << 20, vmem_limit_bytes=96 << 20,
                min_steps=4)


def _norm_2d(x2d, alpha_row, bias_row, *, eps, d_model, fold, cfg):
    """Run the norm over a contiguous 2-D view (rows_v, fold*d_model)."""
    rows_v, lane_width = x2d.shape
    assert lane_width == fold * d_model

    alpha_t = jnp.tile(alpha_row, (1, fold)) if fold > 1 else alpha_row
    bias_t = jnp.tile(bias_row, (1, fold)) if fold > 1 else bias_row

    itemsize = jnp.dtype(x2d.dtype).itemsize
    pack = max(1, 32 // itemsize)            # 8 rows f32 / 16 bf16 / 32 int8
    bytes_per_row_io = lane_width * itemsize
    # Per tile row: 2x in + 2x out pipelined buffers (input dtype) plus ~4
    # f32-sized in-kernel temporaries (x cast, x*x, broadcasts, pre-cast out).
    per_row_vmem = lane_width * (4 * itemsize + 4 * 4)

    budget = int(cfg["vmem_limit_bytes"]) * 3 // 4            # headroom
    tile_vmem = max(pack, (budget // per_row_vmem) // pack * pack)
    tile_tb = max(pack, (cfg["target_block_bytes"] // bytes_per_row_io) // pack * pack)
    # Never collapse to a single grid step on non-tiny inputs.
    tile_steps = max(pack, (pl.cdiv(rows_v, cfg["min_steps"]) // pack) * pack)
    tile_rows = min(tile_vmem, tile_tb, tile_steps)
    if tile_rows >= rows_v:
        tile_rows = rows_v                   # tiny input: one full-extent block
    grid = (pl.cdiv(rows_v, tile_rows),)

    x_spec = pl.BlockSpec((tile_rows, lane_width), lambda i: (i, 0))
    out_spec = pl.BlockSpec((tile_rows, lane_width), lambda i: (i, 0))
    param_spec = pl.BlockSpec((1, lane_width), lambda i: (0, 0))

    if fold == 1:
        kernel = functools.partial(_norm_rowwise_kernel, eps=eps, d_model=d_model)
        in_specs = [x_spec, param_spec, param_spec]
        args = (x2d, alpha_t, bias_t)
    else:
        lane_ids = jnp.arange(lane_width) // d_model
        seg = (lane_ids[:, None] == jnp.arange(fold)[None, :]).astype(jnp.float32)
        segT = jnp.transpose(seg)
        kernel = functools.partial(_norm_folded_kernel, eps=eps, d_model=d_model)
        in_specs = [x_spec, param_spec, param_spec,
                    pl.BlockSpec((lane_width, fold), lambda i: (0, 0)),
                    pl.BlockSpec((fold, lane_width), lambda i: (0, 0))]
        args = (x2d, alpha_t, bias_t, seg, segT)

    n_elems = rows_v * lane_width
    cost = pl.CostEstimate(
        flops=int(10 * n_elems),
        transcendentals=int(2 * rows_v * fold),   # sqrt + reciprocal per row
        bytes_accessed=int(2 * n_elems * itemsize + 2 * lane_width * 4),
    )

    return pl.pallas_call(
        kernel,
        out_shape=jax.ShapeDtypeStruct((rows_v, lane_width), x2d.dtype),
        grid_spec=pltpu.PrefetchScalarGridSpec(
            num_scalar_prefetch=0,
            grid=grid,
            in_specs=in_specs,
            out_specs=out_spec,
        ),
        compiler_params=pltpu.CompilerParams(
            dimension_semantics=("parallel",),
            vmem_limit_bytes=int(cfg["vmem_limit_bytes"]),
        ),
        cost_estimate=cost,
    )(*args)


def norm_pallas(x, alpha, bias, eps=1e-6):
    """Pallas implementation of the PyTorch `Norm` module forward pass."""
    d_model = x.shape[-1]
    if d_model < 2:
        # unbiased std divides by N-1; torch returns NaN for N==1.
        raise ValueError("norm_pallas requires d_model >= 2")

    orig_shape = x.shape
    x2 = x.reshape(-1, d_model)
    rows = x2.shape[0]
    cfg = _tpu_config()

    # Pre-cast params once in the wrapper (no per-step cast inside the kernel).
    alpha_row = alpha.astype(jnp.float32).reshape(1, d_model)
    bias_row = bias.astype(jnp.float32).reshape(1, d_model)

    # Lane-dense folding: pack `fold` logical rows into one 128-lane row when
    # d_model divides 128 (avoids masked vst.msk stores / wasted lanes).
    fold = 1
    if d_model < 128 and 128 % d_model == 0:
        fold = 128 // d_model

    if fold == 1 or rows < fold:
        out2 = _norm_2d(x2, alpha_row, bias_row, eps=eps, d_model=d_model,
                        fold=1, cfg=cfg)
    else:
        rem = rows % fold
        rows_main = rows - rem
        x_main = x2[:rows_main].reshape(rows_main // fold, fold * d_model)
        out_main = _norm_2d(x_main, alpha_row, bias_row, eps=eps,
                            d_model=d_model, fold=fold, cfg=cfg)
        out_main = out_main.reshape(rows_main, d_model)
        if rem == 0:
            out2 = out_main
        else:
            # Tiny (< fold rows) tail handled by the row-wise kernel so the big
            # main chunk keeps lane-dense 128-wide stores.
            out_tail = _norm_2d(x2[rows_main:], alpha_row, bias_row, eps=eps,
                                d_model=d_model, fold=1, cfg=cfg)
            # TODO(synk): for huge inputs this concatenate re-copies the main
            # chunk in HBM; could be avoided with output aliasing/donation.
            out2 = jnp.concatenate([out_main, out_tail], axis=0)

    return out2.reshape(orig_shape)


def norm_ref(x, alpha, bias, eps=1e-6):
    """Pure-JAX reference matching the PyTorch module exactly."""
    xf = x.astype(jnp.float32)
    mean = jnp.mean(xf, axis=-1, keepdims=True)
    xc = xf - mean
    var = jnp.sum(xc * xc, axis=-1, keepdims=True) / (x.shape[-1] - 1)
    std = jnp.sqrt(var)
    return (alpha.astype(jnp.float32) * xc / (std + eps)
            + bias.astype(jnp.float32)).astype(x.dtype)


if __name__ == "__main__":
    key = jax.random.PRNGKey(0)
    k1, k2, k3, k4 = jax.random.split(key, 4)

    # Primary test: mirrors the module spec (d_model=32) -> lane-dense fold path.
    d_model = 32
    alpha = jnp.ones((d_model,), dtype=jnp.float32)   # nn.Parameter(torch.ones)
    bias = jnp.zeros((d_model,), dtype=jnp.float32)   # nn.Parameter(torch.zeros)
    x = jax.random.normal(k1, (2, 8, d_model), dtype=jnp.float32)
    out = jax.block_until_ready(norm_pallas(x, alpha, bias))
    ref = norm_ref(x, alpha, bias)
    assert out.shape == x.shape
    assert jnp.allclose(out, ref, atol=1e-5, rtol=1e-5), "mismatch (folded path)"

    # Row-wise path (d_model multiple of 128), multi-block grid.
    d_model2 = 128
    alpha2 = jnp.ones((d_model2,), dtype=jnp.float32)
    bias2 = jnp.zeros((d_model2,), dtype=jnp.float32)
    x2 = jax.random.normal(k2, (4, 6, d_model2), dtype=jnp.float32)
    out2 = jax.block_until_ready(norm_pallas(x2, alpha2, bias2))
    ref2 = norm_ref(x2, alpha2, bias2)
    assert jnp.allclose(out2, ref2, atol=1e-5, rtol=1e-5), "mismatch (rowwise path)"

    # Folded path with a non-divisible row count (prefix folded + tiny tail).
    x3 = jax.random.normal(k3, (3, 6, d_model), dtype=jnp.float32)   # 18 rows, fold=4
    out3 = jax.block_until_ready(norm_pallas(x3, alpha, bias))
    ref3 = norm_ref(x3, alpha, bias)
    assert jnp.allclose(out3, ref3, atol=1e-5, rtol=1e-5), "mismatch (folded+tail)"

    # bf16 input exercises the widened f32-temporary VMEM accounting.
    x4 = jax.random.normal(k4, (2, 8, d_model), dtype=jnp.bfloat16)
    out4 = jax.block_until_ready(norm_pallas(x4, alpha, bias))
    ref4 = norm_ref(x4, alpha, bias)
    assert jnp.allclose(out4.astype(jnp.float32), ref4.astype(jnp.float32),
                        atol=2e-2, rtol=2e-2), "mismatch (bf16)"

    print("KERNEL_OK")
</pallas_src>

<mosaic_0001>
module attributes {stable_mosaic.version = 11 : i64} {
  func.func @_norm_folded_kernel(%arg0: i32, %arg1: memref<4x128xf32, #tpu.memory_space<vmem>>, %arg2: memref<1x128xf32, #tpu.memory_space<vmem>>, %arg3: memref<1x128xf32, #tpu.memory_space<vmem>>, %arg4: memref<128x4xf32, #tpu.memory_space<vmem>>, %arg5: memref<4x128xf32, #tpu.memory_space<vmem>>, %arg6: memref<4x128xf32, #tpu.memory_space<vmem>>) attributes {dimension_semantics = [#tpu.dimension_semantics<parallel>], iteration_bounds = array<i64: 1>, scalar_prefetch = 0 : i64, scratch_operands = 0 : i64, tpu.core_type = #tpu.core_type<tc>, window_params = [{transform_indices = @transform_0, window_bounds = array<i64: 4, 128>}, {pipeline_mode = #tpu.pipeline_mode<synchronous>, transform_indices = @transform_1, window_bounds = array<i64: 1, 128>}, {pipeline_mode = #tpu.pipeline_mode<synchronous>, transform_indices = @transform_2, window_bounds = array<i64: 1, 128>}, {pipeline_mode = #tpu.pipeline_mode<synchronous>, transform_indices = @transform_3, window_bounds = array<i64: 128, 4>}, {pipeline_mode = #tpu.pipeline_mode<synchronous>, transform_indices = @transform_4, window_bounds = array<i64: 4, 128>}, {transform_indices = @transform_5, window_bounds = array<i64: 4, 128>}]} {
    %c0 = arith.constant 0 : index
    %c0_0 = arith.constant 0 : index
    %0 = vector.load %arg1[%c0, %c0_0] : memref<4x128xf32, #tpu.memory_space<vmem>>, vector<4x128xf32>
    %c0_1 = arith.constant 0 : index
    %c0_2 = arith.constant 0 : index
    %1 = vector.load %arg4[%c0_1, %c0_2] : memref<128x4xf32, #tpu.memory_space<vmem>>, vector<128x4xf32>
    %c0_3 = arith.constant 0 : index
    %c0_4 = arith.constant 0 : index
    %2 = vector.load %arg5[%c0_3, %c0_4] : memref<4x128xf32, #tpu.memory_space<vmem>>, vector<4x128xf32>
    %cst = arith.constant dense<0.000000e+00> : vector<4x4xf32>
    %3 = tpu.matmul %0, %1, %cst {dimension_numbers = #tpu.dot_dimension_numbers<[1], [0], [0], [1], [0, 0, 1, 1], [], []>} : vector<4x128xf32>, vector<128x4xf32>, vector<4x4xf32> -> vector<4x4xf32>
    %4 = arith.mulf %0, %0 : vector<4x128xf32>
    %cst_5 = arith.constant dense<0.000000e+00> : vector<4x4xf32>
    %5 = tpu.matmul %4, %1, %cst_5 {dimension_numbers = #tpu.dot_dimension_numbers<[1], [0], [0], [1], [0, 0, 1, 1], [], []>} : vector<4x128xf32>, vector<128x4xf32>, vector<4x4xf32> -> vector<4x4xf32>
    %cst_6 = arith.constant 3.125000e-02 : f32
    %6 = vector.broadcast %cst_6 : f32 to vector<4x4xf32>
    %7 = arith.mulf %3, %6 : vector<4x4xf32>
    %8 = arith.mulf %3, %7 : vector<4x4xf32>
    %9 = arith.subf %5, %8 : vector<4x4xf32>
    %cst_7 = arith.constant 0.0322580636 : f32
    %10 = vector.broadcast %cst_7 : f32 to vector<4x4xf32>
    %11 = arith.mulf %9, %10 : vector<4x4xf32>
    %cst_8 = arith.constant 0.000000e+00 : f32
    %12 = vector.broadcast %cst_8 : f32 to vector<4x4xf32>
    %13 = arith.maximumf %11, %12 : vector<4x4xf32>
    %14 = math.sqrt %13 : vector<4x4xf32>
    %cst_9 = arith.constant 9.99999997E-7 : f32
    %15 = vector.broadcast %cst_9 : f32 to vector<4x4xf32>
    %16 = arith.addf %14, %15 : vector<4x4xf32>
    %17 = tpu.reciprocal %16 : vector<4x4xf32> -> vector<4x4xf32>
    %cst_10 = arith.constant dense<0.000000e+00> : vector<4x128xf32>
    %18 = tpu.matmul %17, %2, %cst_10 {dimension_numbers = #tpu.dot_dimension_numbers<[1], [0], [0], [1], [0, 0, 1, 1], [], []>} : vector<4x4xf32>, vector<4x128xf32>, vector<4x128xf32> -> vector<4x128xf32>
    %19 = arith.mulf %7, %17 : vector<4x4xf32>
    %cst_11 = arith.constant dense<0.000000e+00> : vector<4x128xf32>
    %20 = tpu.matmul %19, %2, %cst_11 {dimension_numbers = #tpu.dot_dimension_numbers<[1], [0], [0], [1], [0, 0, 1, 1], [], []>} : vector<4x4xf32>, vector<4x128xf32>, vector<4x128xf32> -> vector<4x128xf32>
    %c0_12 = arith.constant 0 : index
    %c0_13 = arith.constant 0 : index
    %21 = vector.load %arg2[%c0_12, %c0_13] : memref<1x128xf32, #tpu.memory_space<vmem>>, vector<1x128xf32>
    %22 = arith.mulf %0, %18 : vector<4x128xf32>
    %23 = arith.subf %22, %20 : vector<4x128xf32>
    %24 = vector.broadcast %21 : vector<1x128xf32> to vector<4x128xf32>
    %25 = arith.mulf %24, %23 : vector<4x128xf32>
    %c0_14 = arith.constant 0 : index
    %c0_15 = arith.constant 0 : index
    %26 = vector.load %arg3[%c0_14, %c0_15] : memref<1x128xf32, #tpu.memory_space<vmem>>, vector<1x128xf32>
    %27 = vector.broadcast %26 : vector<1x128xf32> to vector<4x128xf32>
    %28 = arith.addf %25, %27 : vector<4x128xf32>
    %c0_16 = arith.constant 0 : index
    %c0_17 = arith.constant 0 : index
    %29 = vector.load %arg6[%c0_16, %c0_17] : memref<4x128xf32, #tpu.memory_space<vmem>>, vector<4x128xf32>
    tpu.vector_store %arg6[%c0_16, %c0_17], %28 {strides = array<i32>} : memref<4x128xf32, #tpu.memory_space<vmem>>, vector<4x128xf32>,
    return
  }
  func.func @transform_0(%arg0: i32) -> (i32, i32) {
    %c0_i32 = arith.constant 0 : i32
    %c0_i32_0 = arith.constant 0 : i32
    return %arg0, %c0_i32 : i32, i32
  }
  func.func @transform_1(%arg0: i32) -> (i32, i32) {
    %c0_i32 = arith.constant 0 : i32
    %c0_i32_0 = arith.constant 0 : i32
    %c0_i32_1 = arith.constant 0 : i32
    return %c0_i32, %c0_i32_0 : i32, i32
  }
  func.func @transform_2(%arg0: i32) -> (i32, i32) {
    %c0_i32 = arith.constant 0 : i32
    %c0_i32_0 = arith.constant 0 : i32
    %c0_i32_1 = arith.constant 0 : i32
    return %c0_i32, %c0_i32_0 : i32, i32
  }
  func.func @transform_3(%arg0: i32) -> (i32, i32) {
    %c0_i32 = arith.constant 0 : i32
    %c0_i32_0 = arith.constant 0 : i32
    %c0_i32_1 = arith.constant 0 : i32
    return %c0_i32, %c0_i32_0 : i32, i32
  }
  func.func @transform_4(%arg0: i32) -> (i32, i32) {
    %c0_i32 = arith.constant 0 : i32
    %c0_i32_0 = arith.constant 0 : i32
    %c0_i32_1 = arith.constant 0 : i32
    return %c0_i32, %c0_i32_0 : i32, i32
  }
  func.func @transform_5(%arg0: i32) -> (i32, i32) {
    %c0_i32 = arith.constant 0 : i32
    %c0_i32_0 = arith.constant 0 : i32
    return %arg0, %c0_i32 : i32, i32
  }
}

</mosaic_0001>

<bundles_post_ra>
// kernel: tpu_custom_call.1
= control target key start
LH: loop header
LB: loop body
LE: loop exit
PB: predicated region body
PF: predicated region fallthrough
CT: control target
= control target key end

     0   :  { %v532_v1 = vmov 0.0   ;;  %s666_s0 = inlined_call_operand.vmem [shape: f32[4,128], index: 0, kind: input, shape index: {}]   ;;  %s667_s1 = inlined_call_operand.vmem [shape: f32[1,128], index: 1, kind: input, shape index: {}]   ;;  %s668_s2 = inlined_call_operand.vmem [shape: f32[1,128], index: 2, kind: input, shape index: {}]   ;;  %s669_s3 = inlined_call_operand.vmem [shape: f32[128,4], index: 3, kind: input, shape index: {}]   ;;  %s670_s4 = inlined_call_operand.vmem [shape: f32[4,128], index: 4, kind: input, shape index: {}]   ;;  %s671_s5 = inlined_call_operand.hbm [shape: f32[4,128], index: 5, kind: output, shape index: {}]  }
   0x1   :  { %v37_v0 = vld [vmem:[%s669_s3 + $0x78] sm:$0xff]  ;;  %423 = vmatprep.subr.mxu0 %v532_v1  ;;  %458 = vmatprep.subr.mxu1 %v532_v1  ;;  %v36_v2 = vld [vmem:[%s669_s3 + $0x70] sm:$0xff]  ;;  %v35_v3 = vld [vmem:[%s669_s3 + $0x68] sm:$0xff] }
   0x2   :  { %424 = vmatpush3.msra.mxu0 %v37_v0  ;;  %459 = vmatpush3.msra.mxu1 %v37_v0  ;;  %v34_v4 = vld [vmem:[%s669_s3 + $0x60] sm:$0xff] }
   0x3   :  { %425 = vmatprep.subr.mxu0 %v532_v1  ;;  %460 = vmatprep.subr.mxu1 %v532_v1 }
   0x4   :  { %426 = vmatpush3.msra.mxu0 %v36_v2  ;;  %461 = vmatpush3.msra.mxu1 %v36_v2 }
   0x5   :  { %427 = vmatprep.subr.mxu0 %v532_v1  ;;  %462 = vmatprep.subr.mxu1 %v532_v1 }
   0x6   :  { %10 = vsyncpa [#allocation3], 0  ;;  %428 = vmatpush3.msra.mxu0 %v35_v3  ;;  %463 = vmatpush3.msra.mxu1 %v35_v3  ;;  %v33_v5 = vld [vmem:[%s669_s3 + $0x58] sm:$0xff]  ;;  %v32_v6 = vld [vmem:[%s669_s3 + $0x50] sm:$0xff]  ;;  %vm533_vm0 = vmmov 0   ;;  %vm198_vm1 = vcmask 1043456  }
   0x7   :  { %429 = vmatprep.subr.mxu0 %v532_v1  ;;  %464 = vmatprep.subr.mxu1 %v532_v1  ;;  %v31_v7 = vld [vmem:[%s669_s3 + $0x48] sm:$0xff]  ;;  %v30_v8 = vld [vmem:[%s669_s3 + $0x40] sm:$0xff]  ;;  %v29_v9 = vld [vmem:[%s669_s3 + $0x38] sm:$0xff]  ;;  %vm194_vm4 = vcmask 31744   ;;  %s534_s30 = smov [#allocation2]  }
   0x8   :  { %430 = vmatpush3.msra.mxu0 %v34_v4  ;;  %465 = vmatpush3.msra.mxu1 %v34_v4  ;;  %v28_v10 = vld [vmem:[%s669_s3 + $0x30] sm:$0xff]  ;;  %v27_v11 = vld [vmem:[%s669_s3 + $0x28] sm:$0xff]  ;;  %v26_v12 = vld [vmem:[%s669_s3 + $0x20] sm:$0xff]  ;;  %s371_s6 = sshll.u32 %s534_s30, 4  ;;  %s372_s6 = int_to_ptr.vmem [resolvable:$true] %s371_s6 }
   0x9   :  { %431 = vmatprep.subr.mxu0 %v532_v1  ;;  %466 = vmatprep.subr.mxu1 %v532_v1  ;;  %v25_v13 = vld [vmem:[%s669_s3 + $0x18] sm:$0xff]  ;;  %v24_v14 = vld [vmem:[%s669_s3 + $0x10] sm:$0xff]  ;;  %v23_v15 = vld [vmem:[%s669_s3 + $0x8] sm:$0xff]  ;;  %s510_s7 = scalar_lea.vmem %s372_s6, 64  ;;  %p515_p1 = scmp.lt.s32.totalorder %s372_s6, %s372_s6 }
   0xa   :  { %432 = vmatpush3.msra.mxu0 %v33_v5  ;;  %467 = vmatpush3.msra.mxu1 %v33_v5  ;;  %v21_v16 = vld [vmem:[%s666_s0] sm:$0xf]  ;;  %p511_p0 = scmp.ne.s32.totalorder %s372_s6, %s510_s7  ;;  %p516_p2 = scmp.lt.s32.totalorder %s510_s7, %s510_s7 }
   0xb   :  { %433 = vmatprep.subr.mxu0 %v532_v1  ;;  %468 = vmatprep.subr.mxu1 %v532_v1  ;;  %v22_v17 = vld [vmem:[%s669_s3] sm:$0xff]  ;;  %v109_v18 = vmul.f32 %v21_v16, %v21_v16 }
   0xc   :  { %434 = vmatpush3.msra.mxu0 %v32_v6  ;;  %469 = vmatpush3.msra.mxu1 %v32_v6  ;;  %v38_v19 = vld [vmem:[%s670_s4] sm:$0xf]  ;;  %p517_p3 = por %p516_p2, %p515_p1 }
   0xd   :  { %435 = vmatprep.subr.mxu0 %v532_v1  ;;  %470 = vmatprep.subr.mxu1 %v532_v1  ;;  %v383_v41 = vld [vmem:[%s667_s1] ss:$0 sm:$0xff] }
   0xe   :  { %436 = vmatpush3.msra.mxu0 %v31_v7  ;;  %471 = vmatpush3.msra.mxu1 %v31_v7  ;;  %v384_v44 = vld [vmem:[%s668_s2] ss:$0 sm:$0xff]  ;;  %p518_p4 = pnand %p517_p3, %p511_p0 }
   0xf   :  { %437 = vmatprep.subr.mxu0 %v532_v1  ;;  %472 = vmatprep.subr.mxu1 %v532_v1 }
  0x10   :  { %438 = vmatpush3.msra.mxu0 %v30_v8  ;;  %473 = vmatpush3.msra.mxu1 %v30_v8 }
  0x11   :  { %439 = vmatprep.subr.mxu0 %v532_v1  ;;  %474 = vmatprep.subr.mxu1 %v532_v1 }
  0x12   :  { %440 = vmatpush3.msra.mxu0 %v29_v9  ;;  %475 = vmatpush3.msra.mxu1 %v29_v9 }
  0x13   :  { %441 = vmatprep.subr.mxu0 %v532_v1  ;;  %476 = vmatprep.subr.mxu1 %v532_v1 }
  0x14   :  { %442 = vmatpush3.msra.mxu0 %v28_v10  ;;  %477 = vmatpush3.msra.mxu1 %v28_v10 }
  0x15   :  { %443 = vmatprep.subr.mxu0 %v532_v1  ;;  %478 = vmatprep.subr.mxu1 %v532_v1 }
  0x16   :  { %444 = vmatpush3.msra.mxu0 %v27_v11  ;;  %479 = vmatpush3.msra.mxu1 %v27_v11 }
  0x17   :  { %445 = vmatprep.subr.mxu0 %v532_v1  ;;  %480 = vmatprep.subr.mxu1 %v532_v1 }
  0x18   :  { %446 = vmatpush3.msra.mxu0 %v26_v12  ;;  %481 = vmatpush3.msra.mxu1 %v26_v12 }
  0x19   :  { %447 = vmatprep.subr.mxu0 %v532_v1  ;;  %482 = vmatprep.subr.mxu1 %v532_v1 }
  0x1a   :  { %448 = vmatpush3.msra.mxu0 %v25_v13  ;;  %483 = vmatpush3.msra.mxu1 %v25_v13 }
  0x1b   :  { %449 = vmatprep.subr.mxu0 %v532_v1  ;;  %484 = vmatprep.subr.mxu1 %v532_v1 }
  0x1c   :  { %450 = vmatpush3.msra.mxu0 %v24_v14  ;;  %485 = vmatpush3.msra.mxu1 %v24_v14 }
  0x1d   :  { %451 = vmatprep.subr.mxu0 %v532_v1  ;;  %486 = vmatprep.subr.mxu1 %v532_v1 }
  0x1e   :  { %452 = vmatpush3.msra.mxu0 %v23_v15  ;;  %455 = vmatprep.mubr.msk.f32.mxu0 %vm533_vm0, %v532_v1 }
  0x1f   :  { %453 = vmatprep.subr.mxu0 %v532_v1  ;;  %487 = vmatpush3.msra.mxu1 %v23_v15 }
  0x20   :  { %454 = vmatpush3.msra.mxu0 %v22_v17  ;;  %488 = vmatprep.subr.mxu1 %v532_v1 }
  0x21   :  { %456 = vmatmul.mubr.f32.vlgmr.msra.gmra.mxu0 %v21_v16  ;;  %489 = vmatpush3.msra.mxu1 %v22_v17 }
  0x22   :  { %490 = vmatprep.mubr.msk.f32.mxu1 %vm533_vm0, %v532_v1  ;;  %493 = vmatprep.subr.mxu0 %v532_v1 }
  0x23   :  { %491 = vmatmul.mubr.f32.vlgmr.msra.gmra.mxu1 %v109_v18  ;;  %498 = vmatprep.subr.mxu1 %v532_v1 }
  0x24   :  { %495 = vmatprep.mubr.msk.f32.mxu0 %vm533_vm0, %v532_v1  ;;  %500 = vmatprep.mubr.msk.f32.mxu1 %vm533_vm0, %v532_v1 }
  0x25   :  { %494 = vmatpush3.msk.msra.mxu0 %vm198_vm1, %v38_v19  ;;  %499 = vmatpush3.msk.msra.mxu1 %vm198_vm1, %v38_v19 }
  0xe1   :  { %v105_v20 = vpop.f32.mrf.mxu0 }
  0xe2   :  { %v180_v21 = vmul.f32 0.03125, %v105_v20 }
  0xe3   :  { %v457_v22 = vpop.f32.mrf.mxu0  ;;  %v176_v23 = vpop.f32.mrf.mxu1 }
  0xe4   :  { %v181_v24 = vmul.f32 %v180_v21, %v105_v20 }
  0xe5   :  { %v492_v25 = vpop.f32.mrf.mxu1 }
  0xe6   :  { %v182_v26 = vsub.f32 %v176_v23, %v181_v24 }
  0xe8   :  { %v183_v27 = vmul.f32 0.032258064, %v182_v26 }
  0xea   :  { %v184_v28 = vmax.f32 %v183_v27, 0.0 }
  0xec   :  { %506 = vrsqrt.f32 %v184_v28  ;;  %vm187_vm2 = vcmp.eq.f32.partialorder %v184_v28, inf  ;;  %v190_v31 = vand.u32 2147483648, %v184_v28  ;;  %vm189_vm3 = vcmp.eq.f32.partialorder %v184_v28, 0.0 }
  0xf9   :  { %v507_v29 = vpop.eup %506 }
  0xfa   :  { %v186_v30 = vmul.f32 %v507_v29, %v184_v28 }
  0xfc   :  { %v188_v32 = vsel %vm187_vm2, %v184_v28, %v186_v30 }
  0xfd   :  { %v191_v33 = vsel %vm189_vm3, %v190_v31, %v188_v32 }
  0xfe   :  { %v192_v34 = vadd.f32 1e-06, %v191_v33 }
 0x100   :  { %508 = vrcp.f32 %v192_v34 }
 0x10d   :  { %v509_v35 = vpop.eup %508 }
 0x10e   :  { %496 = vmatmul.mubr.msk.f32.vlgmr.msra.gmra.mxu0 %vm194_vm4, %v509_v35  ;;  %v272_v36 = vmul.f32 %v509_v35, %v180_v21 }
 0x110   :  { %501 = vmatmul.mubr.msk.f32.vlgmr.msra.gmra.mxu1 %vm194_vm4, %v272_v36 }
 0x1ce   :  { %v268_v37 = vpop.f32.mrf.mxu0 }
 0x1cf   :  { %v347_v38 = vmul.f32 %v268_v37, %v21_v16 }
 0x1d0   :  { %v497_v39 = vpop.f32.mrf.mxu0  ;;  %v342_v40 = vpop.f32.mrf.mxu1 }
 0x1d1   :  { %v348_v42 = vsub.f32 %v347_v38, %v342_v40 }
 0x1d2   :  { %v502_v43 = vpop.f32.mrf.mxu1 }
 0x1d3   :  { %v355_v45 = vmul.f32 %v383_v41, %v348_v42 }
 0x1d5   :  { %v363_v46 = vadd.f32 %v384_v44, %v355_v45 }
 0x1d7   :  { %364 = vst [vmem:[#allocation2] sm:$0xf] %v363_v46 }
 0x1d8   :  { %521 = shalt.err (!%p518_p4)
}
 0x1d9   :  { %374 = dma.vmem_to_hbm [thread:$0]  %s372_s6, 64, %s671_s5, [#allocation3]  }
 0x1da   :  { %530 = dma.done.wait [#allocation3], 64  }
 0x1db   :  { %531 = vsyncadd [#allocation3], 4294967232 }
 0x1dc   :  { %378 = vsyncpa [#allocation3], 1 }

</bundles_post_ra>
